<compile_context>
chip_gen: v6e
topology: v6e:2x2x1
jax: 0.10.0
libtpu: 0.0.40
codegen_flags: <defaults>
</compile_context>

<pallas_src>
import jax
import jax.numpy as jnp
from jax.experimental import pallas as pl
from jax.experimental.pallas import tpu as pltpu


def _round_up(a: int, m: int) -> int:
    return (a + m - 1) // m * m


def _value_head_kernel(x_ref, w1_ref, b1_ref, w2_ref, b2_ref, wo_ref, bo_ref,
                       o_ref):
    # x tile: [TM, input_size]. bf16 operands on the MXU, f32 accumulation.
    x = x_ref[...].astype(jnp.bfloat16)          # no-op if x is already bf16

    # Layer 1: Linear(in -> hid) + ReLU. Cast to bf16 at the point the
    # activation is produced so the staged intermediate is half as wide.
    h = jnp.maximum(
        jnp.dot(x, w1_ref[...], preferred_element_type=jnp.float32)
        + b1_ref[...], 0.0).astype(jnp.bfloat16)

    # Layers 2 & 3: Linear(hid -> hid) + ReLU using the SAME weights twice
    # (the torch module repeats one ValueHeadCore object). Load once, reuse.
    w2 = w2_ref[...]
    b2 = b2_ref[...]
    h = jnp.maximum(
        jnp.dot(h, w2, preferred_element_type=jnp.float32) + b2,
        0.0).astype(jnp.bfloat16)
    h = jnp.maximum(
        jnp.dot(h, w2, preferred_element_type=jnp.float32) + b2,
        0.0).astype(jnp.bfloat16)

    # Output projection: Linear(hid -> out), no activation. Bias add in f32.
    out = (jnp.dot(h, wo_ref[...], preferred_element_type=jnp.float32)
           + bo_ref[...])
    o_ref[...] = out.astype(o_ref.dtype)


def _call(x, w1b, b1, w2b, b2, wob, bo, *, tm, grid, out_size,
          single_buffer_weights):
    """Build and invoke the pallas_call."""
    B, in_size = x.shape

    if single_buffer_weights:
        # Constant index_map -> never re-fetched; one buffer halves the VMEM
        # these blocks occupy (matters at production widths on v7x's 64 MiB).
        def resident(a):
            return pl.BlockSpec(a.shape, lambda i: (0, 0),
                                pipeline_mode=pl.Buffered(1))
    else:
        def resident(a):
            return pl.BlockSpec(a.shape, lambda i: (0, 0))

    return pl.pallas_call(
        _value_head_kernel,
        out_shape=jax.ShapeDtypeStruct((B, out_size), x.dtype),
        grid=grid,
        in_specs=[
            pl.BlockSpec((tm, in_size), lambda i: (i, 0)),   # x row tile
            resident(w1b), resident(b1),
            resident(w2b), resident(b2),
            resident(wob), resident(bo),
        ],
        # Unpadded output: block last dim == full array last dim (legal), so
        # writeback is exactly B * out_size elements.
        out_specs=pl.BlockSpec((tm, out_size), lambda i: (i, 0)),
        compiler_params=pltpu.CompilerParams(
            dimension_semantics=("parallel",)),   # megacore batch sharding
    )(x, w1b, b1, w2b, b2, wob, bo)


def value_head_forward(x, params, *, block_m: int = 1024):
    """x: [B, input_size] (f32 or bf16); params: transposed weights/biases."""
    w1, b1 = params["w1"], params["b1"]   # [in, hid], [1, hid]
    w2, b2 = params["w2"], params["b2"]   # [hid, hid], [1, hid] (shared layer)
    wo, bo = params["wo"], params["bo"]   # [hid, out], [1, out]

    B, _ = x.shape
    out_size = wo.shape[1]

    # bf16 weights for the MXU; biases stay f32 for the VPU adds.
    w1b = w1.astype(jnp.bfloat16)
    w2b = w2.astype(jnp.bfloat16)
    wob = wo.astype(jnp.bfloat16)

    # Row tile: as large as block_m allows (amortizes per-grid-step overhead),
    # capped so that for B >= 256 there are at least 2 grid steps (both v7x
    # TensorCores get work). No batch padding: Pallas masks the boundary
    # block, which is safe because there is no cross-row reduction and only
    # valid output rows are written.
    tm = min(block_m, _round_up(B, 8))
    if B >= 256:
        tm = min(tm, _round_up(pl.cdiv(B, 2), 8))
    grid = (pl.cdiv(B, tm),)

    kwargs = dict(tm=tm, grid=grid, out_size=out_size)
    try:
        return _call(x, w1b, b1, w2b, b2, wob, bo,
                     single_buffer_weights=True, **kwargs)
    except Exception:
        # pipeline_mode=pl.Buffered(1) unsupported in this jax build; fall
        # back to default double-buffered resident blocks (same semantics).
        return _call(x, w1b, b1, w2b, b2, wob, bo,
                     single_buffer_weights=False, **kwargs)


def init_params(key, input_size, hidden_size, output_size):
    """torch.nn.Linear-style init: U(-1/sqrt(fan_in), +1/sqrt(fan_in))."""
    def linear(k, fan_in, fan_out):
        kw, kb = jax.random.split(k)
        bound = 1.0 / jnp.sqrt(fan_in)
        # stored transposed: [fan_in, fan_out] so the kernel computes x @ W + b
        w = jax.random.uniform(kw, (fan_in, fan_out), jnp.float32, -bound, bound)
        b = jax.random.uniform(kb, (1, fan_out), jnp.float32, -bound, bound)
        return w, b

    k1, k2, ko = jax.random.split(key, 3)
    w1, b1 = linear(k1, input_size, hidden_size)
    w2, b2 = linear(k2, hidden_size, hidden_size)   # shared by layers 2 and 3
    wo, bo = linear(ko, hidden_size, output_size)
    return {"w1": w1, "b1": b1, "w2": w2, "b2": b2, "wo": wo, "bo": bo}


def reference_forward(x, p):
    """Pure f32 reference with the shared-w2 repeat (matches the torch module)."""
    h = jnp.maximum(x @ p["w1"] + p["b1"], 0.0)
    h = jnp.maximum(h @ p["w2"] + p["b2"], 0.0)
    h = jnp.maximum(h @ p["w2"] + p["b2"], 0.0)   # shared-weight repeat
    return h @ p["wo"] + p["bo"]


if __name__ == "__main__":
    # Small, deterministic shapes consistent with the module (hidden shrunk
    # from the default 512 for a quick smoke test).
    batch, input_size, hidden_size, output_size = 8, 32, 128, 8

    key = jax.random.PRNGKey(0)
    kx, kp = jax.random.split(key)
    x = jax.random.normal(kx, (batch, input_size), jnp.float32)
    params = init_params(kp, input_size, hidden_size, output_size)

    out = value_head_forward(x, params)
    jax.block_until_ready(out)

    ref = reference_forward(x, params)
    assert out.shape == (batch, output_size), out.shape
    # bf16 MXU operands + bf16-staged activations vs. a pure-f32 reference.
    max_diff = jnp.max(jnp.abs(out - ref))
    assert jnp.allclose(out, ref, atol=5e-2, rtol=5e-2), \
        f"max abs diff {max_diff}"

    print("KERNEL_OK")
</pallas_src>

<mosaic_0001>
module attributes {stable_mosaic.version = 11 : i64} {
  func.func @_value_head_kernel(%arg0: i32, %arg1: memref<8x32xf32, #tpu.memory_space<vmem>>, %arg2: memref<32x128xbf16, #tpu.memory_space<vmem>>, %arg3: memref<1x128xf32, #tpu.memory_space<vmem>>, %arg4: memref<128x128xbf16, #tpu.memory_space<vmem>>, %arg5: memref<1x128xf32, #tpu.memory_space<vmem>>, %arg6: memref<128x8xbf16, #tpu.memory_space<vmem>>, %arg7: memref<1x8xf32, #tpu.memory_space<vmem>>, %arg8: memref<8x8xf32, #tpu.memory_space<vmem>>) attributes {dimension_semantics = [#tpu.dimension_semantics<parallel>], iteration_bounds = array<i64: 1>, scalar_prefetch = 0 : i64, scratch_operands = 0 : i64, tpu.core_type = #tpu.core_type<tc>, window_params = [{transform_indices = @transform_0, window_bounds = array<i64: 8, 32>}, {pipeline_mode = #tpu.pipeline_mode<synchronous>, transform_indices = @transform_1, window_bounds = array<i64: 32, 128>}, {pipeline_mode = #tpu.pipeline_mode<synchronous>, transform_indices = @transform_2, window_bounds = array<i64: 1, 128>}, {pipeline_mode = #tpu.pipeline_mode<synchronous>, transform_indices = @transform_3, window_bounds = array<i64: 128, 128>}, {pipeline_mode = #tpu.pipeline_mode<synchronous>, transform_indices = @transform_4, window_bounds = array<i64: 1, 128>}, {pipeline_mode = #tpu.pipeline_mode<synchronous>, transform_indices = @transform_5, window_bounds = array<i64: 128, 8>}, {pipeline_mode = #tpu.pipeline_mode<synchronous>, transform_indices = @transform_6, window_bounds = array<i64: 1, 8>}, {transform_indices = @transform_7, window_bounds = array<i64: 8, 8>}]} {
    %c0 = arith.constant 0 : index
    %c0_0 = arith.constant 0 : index
    %0 = vector.load %arg1[%c0, %c0_0] : memref<8x32xf32, #tpu.memory_space<vmem>>, vector<8x32xf32>
    %1 = arith.truncf %0 : vector<8x32xf32> to vector<8x32xbf16>
    %c0_1 = arith.constant 0 : index
    %c0_2 = arith.constant 0 : index
    %2 = vector.load %arg2[%c0_1, %c0_2] : memref<32x128xbf16, #tpu.memory_space<vmem>>, vector<32x128xbf16>
    %cst = arith.constant dense<0.000000e+00> : vector<8x128xf32>
    %3 = tpu.matmul %1, %2, %cst {dimension_numbers = #tpu.dot_dimension_numbers<[1], [0], [0], [1], [0, 0, 1, 1], [], []>} : vector<8x32xbf16>, vector<32x128xbf16>, vector<8x128xf32> -> vector<8x128xf32>
    %c0_3 = arith.constant 0 : index
    %c0_4 = arith.constant 0 : index
    %4 = vector.load %arg3[%c0_3, %c0_4] : memref<1x128xf32, #tpu.memory_space<vmem>>, vector<1x128xf32>
    %5 = vector.broadcast %4 : vector<1x128xf32> to vector<8x128xf32>
    %6 = arith.addf %3, %5 : vector<8x128xf32>
    %cst_5 = arith.constant 0.000000e+00 : f32
    %7 = vector.broadcast %cst_5 : f32 to vector<8x128xf32>
    %8 = arith.maximumf %6, %7 : vector<8x128xf32>
    %9 = arith.truncf %8 : vector<8x128xf32> to vector<8x128xbf16>
    %c0_6 = arith.constant 0 : index
    %c0_7 = arith.constant 0 : index
    %10 = vector.load %arg4[%c0_6, %c0_7] : memref<128x128xbf16, #tpu.memory_space<vmem>>, vector<128x128xbf16>
    %c0_8 = arith.constant 0 : index
    %c0_9 = arith.constant 0 : index
    %11 = vector.load %arg5[%c0_8, %c0_9] : memref<1x128xf32, #tpu.memory_space<vmem>>, vector<1x128xf32>
    %cst_10 = arith.constant dense<0.000000e+00> : vector<8x128xf32>
    %12 = tpu.matmul %9, %10, %cst_10 {dimension_numbers = #tpu.dot_dimension_numbers<[1], [0], [0], [1], [0, 0, 1, 1], [], []>} : vector<8x128xbf16>, vector<128x128xbf16>, vector<8x128xf32> -> vector<8x128xf32>
    %13 = vector.broadcast %11 : vector<1x128xf32> to vector<8x128xf32>
    %14 = arith.addf %12, %13 : vector<8x128xf32>
    %cst_11 = arith.constant 0.000000e+00 : f32
    %15 = vector.broadcast %cst_11 : f32 to vector<8x128xf32>
    %16 = arith.maximumf %14, %15 : vector<8x128xf32>
    %17 = arith.truncf %16 : vector<8x128xf32> to vector<8x128xbf16>
    %cst_12 = arith.constant dense<0.000000e+00> : vector<8x128xf32>
    %18 = tpu.matmul %17, %10, %cst_12 {dimension_numbers = #tpu.dot_dimension_numbers<[1], [0], [0], [1], [0, 0, 1, 1], [], []>} : vector<8x128xbf16>, vector<128x128xbf16>, vector<8x128xf32> -> vector<8x128xf32>
    %19 = vector.broadcast %11 : vector<1x128xf32> to vector<8x128xf32>
    %20 = arith.addf %18, %19 : vector<8x128xf32>
    %cst_13 = arith.constant 0.000000e+00 : f32
    %21 = vector.broadcast %cst_13 : f32 to vector<8x128xf32>
    %22 = arith.maximumf %20, %21 : vector<8x128xf32>
    %23 = arith.truncf %22 : vector<8x128xf32> to vector<8x128xbf16>
    %c0_14 = arith.constant 0 : index
    %c0_15 = arith.constant 0 : index
    %24 = vector.load %arg6[%c0_14, %c0_15] : memref<128x8xbf16, #tpu.memory_space<vmem>>, vector<128x8xbf16>
    %cst_16 = arith.constant dense<0.000000e+00> : vector<8x8xf32>
    %25 = tpu.matmul %23, %24, %cst_16 {dimension_numbers = #tpu.dot_dimension_numbers<[1], [0], [0], [1], [0, 0, 1, 1], [], []>} : vector<8x128xbf16>, vector<128x8xbf16>, vector<8x8xf32> -> vector<8x8xf32>
    %c0_17 = arith.constant 0 : index
    %c0_18 = arith.constant 0 : index
    %26 = vector.load %arg7[%c0_17, %c0_18] : memref<1x8xf32, #tpu.memory_space<vmem>>, vector<1x8xf32>
    %27 = vector.broadcast %26 : vector<1x8xf32> to vector<8x8xf32>
    %28 = arith.addf %25, %27 : vector<8x8xf32>
    %c0_19 = arith.constant 0 : index
    %c0_20 = arith.constant 0 : index
    %29 = vector.load %arg8[%c0_19, %c0_20] : memref<8x8xf32, #tpu.memory_space<vmem>>, vector<8x8xf32>
    tpu.vector_store %arg8[%c0_19, %c0_20], %28 {strides = array<i32>} : memref<8x8xf32, #tpu.memory_space<vmem>>, vector<8x8xf32>,
    return
  }
  func.func @transform_0(%arg0: i32) -> (i32, i32) {
    %c0_i32 = arith.constant 0 : i32
    %c0_i32_0 = arith.constant 0 : i32
    return %arg0, %c0_i32 : i32, i32
  }
  func.func @transform_1(%arg0: i32) -> (i32, i32) {
    %c0_i32 = arith.constant 0 : i32
    %c0_i32_0 = arith.constant 0 : i32
    %c0_i32_1 = arith.constant 0 : i32
    return %c0_i32, %c0_i32_0 : i32, i32
  }
  func.func @transform_2(%arg0: i32) -> (i32, i32) {
    %c0_i32 = arith.constant 0 : i32
    %c0_i32_0 = arith.constant 0 : i32
    %c0_i32_1 = arith.constant 0 : i32
    return %c0_i32, %c0_i32_0 : i32, i32
  }
  func.func @transform_3(%arg0: i32) -> (i32, i32) {
    %c0_i32 = arith.constant 0 : i32
    %c0_i32_0 = arith.constant 0 : i32
    %c0_i32_1 = arith.constant 0 : i32
    return %c0_i32, %c0_i32_0 : i32, i32
  }
  func.func @transform_4(%arg0: i32) -> (i32, i32) {
    %c0_i32 = arith.constant 0 : i32
    %c0_i32_0 = arith.constant 0 : i32
    %c0_i32_1 = arith.constant 0 : i32
    return %c0_i32, %c0_i32_0 : i32, i32
  }
  func.func @transform_5(%arg0: i32) -> (i32, i32) {
    %c0_i32 = arith.constant 0 : i32
    %c0_i32_0 = arith.constant 0 : i32
    %c0_i32_1 = arith.constant 0 : i32
    return %c0_i32, %c0_i32_0 : i32, i32
  }
  func.func @transform_6(%arg0: i32) -> (i32, i32) {
    %c0_i32 = arith.constant 0 : i32
    %c0_i32_0 = arith.constant 0 : i32
    %c0_i32_1 = arith.constant 0 : i32
    return %c0_i32, %c0_i32_0 : i32, i32
  }
  func.func @transform_7(%arg0: i32) -> (i32, i32) {
    %c0_i32 = arith.constant 0 : i32
    %c0_i32_0 = arith.constant 0 : i32
    return %arg0, %c0_i32 : i32, i32
  }
}

module attributes {stable_mosaic.version = 11 : i64} {
  func.func @_value_head_kernel(%arg0: i32, %arg1: memref<8x32xf32, #tpu.memory_space<vmem>>, %arg2: memref<32x128xbf16, #tpu.memory_space<vmem>>, %arg3: memref<1x128xf32, #tpu.memory_space<vmem>>, %arg4: memref<128x128xbf16, #tpu.memory_space<vmem>>, %arg5: memref<1x128xf32, #tpu.memory_space<vmem>>, %arg6: memref<128x8xbf16, #tpu.memory_space<vmem>>, %arg7: memref<1x8xf32, #tpu.memory_space<vmem>>, %arg8: memref<8x8xf32, #tpu.memory_space<vmem>>) attributes {dimension_semantics = [#tpu.dimension_semantics<parallel>], iteration_bounds = array<i64: 1>, scalar_prefetch = 0 : i64, scratch_operands = 0 : i64, tpu.core_type = #tpu.core_type<tc>, window_params = [{transform_indices = @transform_0, window_bounds = array<i64: 8, 32>}, {pipeline_mode = #tpu.pipeline_mode<synchronous>, transform_indices = @transform_1, window_bounds = array<i64: 32, 128>}, {pipeline_mode = #tpu.pipeline_mode<synchronous>, transform_indices = @transform_2, window_bounds = array<i64: 1, 128>}, {pipeline_mode = #tpu.pipeline_mode<synchronous>, transform_indices = @transform_3, window_bounds = array<i64: 128, 128>}, {pipeline_mode = #tpu.pipeline_mode<synchronous>, transform_indices = @transform_4, window_bounds = array<i64: 1, 128>}, {pipeline_mode = #tpu.pipeline_mode<synchronous>, transform_indices = @transform_5, window_bounds = array<i64: 128, 8>}, {pipeline_mode = #tpu.pipeline_mode<synchronous>, transform_indices = @transform_6, window_bounds = array<i64: 1, 8>}, {transform_indices = @transform_7, window_bounds = array<i64: 8, 8>}]} {
    %c0 = arith.constant 0 : index
    %c0_0 = arith.constant 0 : index
    %0 = vector.load %arg1[%c0, %c0_0] : memref<8x32xf32, #tpu.memory_space<vmem>>, vector<8x32xf32>
    %1 = arith.truncf %0 : vector<8x32xf32> to vector<8x32xbf16>
    %c0_1 = arith.constant 0 : index
    %c0_2 = arith.constant 0 : index
    %2 = vector.load %arg2[%c0_1, %c0_2] : memref<32x128xbf16, #tpu.memory_space<vmem>>, vector<32x128xbf16>
    %cst = arith.constant dense<0.000000e+00> : vector<8x128xf32>
    %3 = tpu.matmul %1, %2, %cst {dimension_numbers = #tpu.dot_dimension_numbers<[1], [0], [0], [1], [0, 0, 1, 1], [], []>} : vector<8x32xbf16>, vector<32x128xbf16>, vector<8x128xf32> -> vector<8x128xf32>
    %c0_3 = arith.constant 0 : index
    %c0_4 = arith.constant 0 : index
    %4 = vector.load %arg3[%c0_3, %c0_4] : memref<1x128xf32, #tpu.memory_space<vmem>>, vector<1x128xf32>
    %5 = vector.broadcast %4 : vector<1x128xf32> to vector<8x128xf32>
    %6 = arith.addf %3, %5 : vector<8x128xf32>
    %cst_5 = arith.constant 0.000000e+00 : f32
    %7 = vector.broadcast %cst_5 : f32 to vector<8x128xf32>
    %8 = arith.maximumf %6, %7 : vector<8x128xf32>
    %9 = arith.truncf %8 : vector<8x128xf32> to vector<8x128xbf16>
    %c0_6 = arith.constant 0 : index
    %c0_7 = arith.constant 0 : index
    %10 = vector.load %arg4[%c0_6, %c0_7] : memref<128x128xbf16, #tpu.memory_space<vmem>>, vector<128x128xbf16>
    %c0_8 = arith.constant 0 : index
    %c0_9 = arith.constant 0 : index
    %11 = vector.load %arg5[%c0_8, %c0_9] : memref<1x128xf32, #tpu.memory_space<vmem>>, vector<1x128xf32>
    %cst_10 = arith.constant dense<0.000000e+00> : vector<8x128xf32>
    %12 = tpu.matmul %9, %10, %cst_10 {dimension_numbers = #tpu.dot_dimension_numbers<[1], [0], [0], [1], [0, 0, 1, 1], [], []>} : vector<8x128xbf16>, vector<128x128xbf16>, vector<8x128xf32> -> vector<8x128xf32>
    %13 = vector.broadcast %11 : vector<1x128xf32> to vector<8x128xf32>
    %14 = arith.addf %12, %13 : vector<8x128xf32>
    %cst_11 = arith.constant 0.000000e+00 : f32
    %15 = vector.broadcast %cst_11 : f32 to vector<8x128xf32>
    %16 = arith.maximumf %14, %15 : vector<8x128xf32>
    %17 = arith.truncf %16 : vector<8x128xf32> to vector<8x128xbf16>
    %cst_12 = arith.constant dense<0.000000e+00> : vector<8x128xf32>
    %18 = tpu.matmul %17, %10, %cst_12 {dimension_numbers = #tpu.dot_dimension_numbers<[1], [0], [0], [1], [0, 0, 1, 1], [], []>} : vector<8x128xbf16>, vector<128x128xbf16>, vector<8x128xf32> -> vector<8x128xf32>
    %19 = vector.broadcast %11 : vector<1x128xf32> to vector<8x128xf32>
    %20 = arith.addf %18, %19 : vector<8x128xf32>
    %cst_13 = arith.constant 0.000000e+00 : f32
    %21 = vector.broadcast %cst_13 : f32 to vector<8x128xf32>
    %22 = arith.maximumf %20, %21 : vector<8x128xf32>
    %23 = arith.truncf %22 : vector<8x128xf32> to vector<8x128xbf16>
    %c0_14 = arith.constant 0 : index
    %c0_15 = arith.constant 0 : index
    %24 = vector.load %arg6[%c0_14, %c0_15] : memref<128x8xbf16, #tpu.memory_space<vmem>>, vector<128x8xbf16>
    %cst_16 = arith.constant dense<0.000000e+00> : vector<8x8xf32>
    %25 = tpu.matmul %23, %24, %cst_16 {dimension_numbers = #tpu.dot_dimension_numbers<[1], [0], [0], [1], [0, 0, 1, 1], [], []>} : vector<8x128xbf16>, vector<128x8xbf16>, vector<8x8xf32> -> vector<8x8xf32>
    %c0_17 = arith.constant 0 : index
    %c0_18 = arith.constant 0 : index
    %26 = vector.load %arg7[%c0_17, %c0_18] : memref<1x8xf32, #tpu.memory_space<vmem>>, vector<1x8xf32>
    %27 = vector.broadcast %26 : vector<1x8xf32> to vector<8x8xf32>
    %28 = arith.addf %25, %27 : vector<8x8xf32>
    %c0_19 = arith.constant 0 : index
    %c0_20 = arith.constant 0 : index
    %29 = vector.load %arg8[%c0_19, %c0_20] : memref<8x8xf32, #tpu.memory_space<vmem>>, vector<8x8xf32>
    tpu.vector_store %arg8[%c0_19, %c0_20], %28 {strides = array<i32>} : memref<8x8xf32, #tpu.memory_space<vmem>>, vector<8x8xf32>,
    return
  }
  func.func @transform_0(%arg0: i32) -> (i32, i32) {
    %c0_i32 = arith.constant 0 : i32
    %c0_i32_0 = arith.constant 0 : i32
    return %arg0, %c0_i32 : i32, i32
  }
  func.func @transform_1(%arg0: i32) -> (i32, i32) {
    %c0_i32 = arith.constant 0 : i32
    %c0_i32_0 = arith.constant 0 : i32
    %c0_i32_1 = arith.constant 0 : i32
    return %c0_i32, %c0_i32_0 : i32, i32
  }
  func.func @transform_2(%arg0: i32) -> (i32, i32) {
    %c0_i32 = arith.constant 0 : i32
    %c0_i32_0 = arith.constant 0 : i32
    %c0_i32_1 = arith.constant 0 : i32
    return %c0_i32, %c0_i32_0 : i32, i32
  }
  func.func @transform_3(%arg0: i32) -> (i32, i32) {
    %c0_i32 = arith.constant 0 : i32
    %c0_i32_0 = arith.constant 0 : i32
    %c0_i32_1 = arith.constant 0 : i32
    return %c0_i32, %c0_i32_0 : i32, i32
  }
  func.func @transform_4(%arg0: i32) -> (i32, i32) {
    %c0_i32 = arith.constant 0 : i32
    %c0_i32_0 = arith.constant 0 : i32
    %c0_i32_1 = arith.constant 0 : i32
    return %c0_i32, %c0_i32_0 : i32, i32
  }
  func.func @transform_5(%arg0: i32) -> (i32, i32) {
    %c0_i32 = arith.constant 0 : i32
    %c0_i32_0 = arith.constant 0 : i32
    %c0_i32_1 = arith.constant 0 : i32
    return %c0_i32, %c0_i32_0 : i32, i32
  }
  func.func @transform_6(%arg0: i32) -> (i32, i32) {
    %c0_i32 = arith.constant 0 : i32
    %c0_i32_0 = arith.constant 0 : i32
    %c0_i32_1 = arith.constant 0 : i32
    return %c0_i32, %c0_i32_0 : i32, i32
  }
  func.func @transform_7(%arg0: i32) -> (i32, i32) {
    %c0_i32 = arith.constant 0 : i32
    %c0_i32_0 = arith.constant 0 : i32
    return %arg0, %c0_i32 : i32, i32
  }
}

</mosaic_0001>

<bundles_post_ra>
// kernel: tpu_custom_call.1
= control target key start
LH: loop header
LB: loop body
LE: loop exit
PB: predicated region body
PF: predicated region fallthrough
CT: control target
= control target key end

     0   :  { %12 = vsyncpa [#allocation3], 0  ;;  %s767_s0 = inlined_call_operand.vmem [shape: f32[8,32], index: 0, kind: input, shape index: {}]   ;;  %s768_s1 = inlined_call_operand.hbm [shape: bf16[32,128], index: 1, kind: input, shape index: {}]   ;;  %s769_s2 = inlined_call_operand.vmem [shape: f32[1,128], index: 2, kind: input, shape index: {}]   ;;  %s770_s3 = inlined_call_operand.vmem [shape: bf16[128,128], index: 3, kind: input, shape index: {}]   ;;  %s771_s4 = inlined_call_operand.hbm [shape: f32[1,128], index: 4, kind: input, shape index: {}]   ;;  %s772_s5 = inlined_call_operand.vmem [shape: bf16[128,8], index: 5, kind: input, shape index: {}]   ;;  %s773_s6 = inlined_call_operand.vmem [shape: f32[1,8], index: 6, kind: input, shape index: {}]   ;;  %s774_s7 = inlined_call_operand.hbm [shape: f32[8,8], index: 7, kind: output, shape index: {}]  }
   0x1   :  { %13 = vsyncpa [#allocation6], 0 }
   0x2   :  { %14 = vsyncpa [#allocation4], 0  ;;  %s620_s24 = smov [#allocation2]  }
   0x3   :  { %s22_s25 = sshll.u32 %s620_s24, 4  ;;  %s23_s25 = int_to_ptr.vmem [resolvable:$true] %s22_s25 }
   0x4   :  { %s562_s26 = scalar_lea.vmem %s23_s25, 256  ;;  %p567_p1 = scmp.lt.s32.totalorder %s23_s25, %s23_s25 }
   0x5   :  { %p563_p0 = scmp.ne.s32.totalorder %s23_s25, %s562_s26  ;;  %p568_p2 = scmp.lt.s32.totalorder %s562_s26, %s562_s26 }
   0x7   :  { %p569_p3 = por %p568_p2, %p567_p1 }
   0x9   :  { %p570_p4 = pnand %p569_p3, %p563_p0 }
   0xb   :  { %573 = shalt.err (!%p570_p4)
}
   0xc   :  { %s621_s27 = smov 64   ;;  %s622_s28 = smov 4  }
   0xd   :  { %28 = dma.hbm_to_vmem [thread:$0]  %s768_s1, 256, %s23_s25, [#allocation3], %s621_s27, %s621_s27, %s622_s28  }
   0xe   :  { %s623_s8 = smov [#allocation5]  }
   0xf   :  { %s39_s9 = sshll.u32 %s623_s8, 4  ;;  %s40_s9 = int_to_ptr.vmem [resolvable:$true] %s39_s9 }
  0x10   :  { %s582_s10 = scalar_lea.vmem %s40_s9, 16  ;;  %s586_s11 = scalar_lea.vmem %s40_s9, 32 }
  0x11   :  { %p583_p5 = scmp.ne.s32.totalorder %s40_s9, %s582_s10  ;;  %p587_p6 = scmp.lt.s32.totalorder %s40_s9, %s40_s9 }
  0x12   :  { %p588_p7 = scmp.lt.s32.totalorder %s586_s11, %s582_s10 }
  0x14   :  { %p589_p8 = por %p588_p7, %p587_p6 }
  0x16   :  { %p590_p9 = pnand %p589_p8, %p583_p5 }
  0x18   :  { %593 = shalt.err (!%p590_p9)
}
  0x19   :  { %42 = dma.hbm_to_vmem [thread:$0]  %s771_s4, 16, %s40_s9, [#allocation6]  }
  0x1a   :  { %614 = dma.done.wait [#allocation3], 256  }
  0x1b   :  { %615 = vsyncadd [#allocation3], 4294967040 }
  0x1c   :  { %616 = dma.done.wait [#allocation6], 16  }
  0x1d   :  { %617 = vsyncadd [#allocation6], 4294967280  ;;  %v624_v0 = vmov 0.0   ;;  %vm625_vm0 = vmmov 0   ;;  %v536_v1 = vld [vmem:[#allocation2 + $0x8] sm:$0xff]   ;;  %v537_v2 = vld [vmem:[#allocation2] sm:$0xff]  }
  0x1e   :  { %461 = vmatprep.subr.bf16.mxu0 %v624_v0  ;;  %465 = vmatprep.mubr.msk.bf16.mxu0 %vm625_vm0, %v624_v0  ;;  %v54_v3 = vld [vmem:[%s767_s0] sm:$0xff]  ;;  %v538_v4 = vld [vmem:[%s770_s3 + $0x38] sm:$0xff]   ;;  %v539_v6 = vld [vmem:[%s770_s3 + $0x30] sm:$0xff]   ;;  %vm79_vm1 = vcmask 261120   ;;  %s626_s21 = smov [#allocation7]   ;;  %vm391_vm2 = vcmask 64512  }
  0x1f   :  { %469 = vmatprep.subr.bf16.mxu1 %v624_v0  ;;  %485 = vmatprep.mubr.msk.bf16.mxu1 %vm625_vm0, %v624_v0  ;;  %v55_v5 = vpack.c.bf16 %v54_v3, %v54_v3  ;;  %v540_v7 = vld [vmem:[%s770_s3 + $0x28] sm:$0xff]   ;;  %v541_v8 = vld [vmem:[%s770_s3 + $0x20] sm:$0xff]   ;;  %v542_v9 = vld [vmem:[%s770_s3 + $0x18] sm:$0xff]   ;;  %s399_s22 = sshll.u32 %s626_s21, 4  ;;  %s400_s22 = int_to_ptr.vmem [resolvable:$true] %s399_s22 }
  0x20   :  { %462 = vmatpush3.bf16.msra.mxu0 %v536_v1  ;;  %470 = vmatpush3.bf16.msra.mxu1 %v538_v4  ;;  %v543_v10 = vld [vmem:[%s770_s3 + $0x10] sm:$0xff]   ;;  %v544_v11 = vld [vmem:[%s770_s3 + $0x8] sm:$0xff]   ;;  %v545_v12 = vld [vmem:[%s770_s3] sm:$0xff]   ;;  %p599_p11 = scmp.lt.s32.totalorder %s400_s22, %s400_s22 }
  0x21   :  { %463 = vmatprep.subr.bf16.mxu0 %v624_v0  ;;  %471 = vmatprep.subr.bf16.mxu1 %v624_v0  ;;  %v409_v13 = vld [vmem:[%s769_s2] ss:$0 sm:$0xff]  ;;  %v546_v21 = vld [vmem:[%s772_s5 + $0x38] sm:$0xff]   ;;  %v547_v22 = vld [vmem:[%s772_s5 + $0x30] sm:$0xff]  }
  0x22   :  { %v548_v23 = vld [vmem:[%s772_s5 + $0x28] sm:$0xff]   ;;  %v549_v24 = vld [vmem:[%s772_s5 + $0x20] sm:$0xff]   ;;  %v550_v25 = vld [vmem:[%s772_s5 + $0x18] sm:$0xff]  }
  0x23   :  { %v551_v26 = vld [vmem:[%s772_s5 + $0x10] sm:$0xff]   ;;  %v552_v35 = vld [vmem:[%s772_s5 + $0x8] sm:$0xff]   ;;  %v553_v36 = vld [vmem:[%s772_s5] sm:$0xff]   ;;  %s594_s5 = scalar_lea.vmem %s400_s22, 128 }
  0x24   :  { %464 = vmatpush3.bf16.msra.mxu0 %v537_v2  ;;  %472 = vmatpush3.bf16.msra.mxu1 %v539_v6  ;;  %v413_v27 = vld [vmem:[#allocation5] ss:$0 sm:$0xff]  ;;  %v422_v44 = vld [vmem:[%s773_s6] ss:$0 sm:$0xff]  ;;  %p595_p10 = scmp.ne.s32.totalorder %s400_s22, %s594_s5  ;;  %p600_p12 = scmp.lt.s32.totalorder %s594_s5, %s594_s5 }
  0x25   :  { %489 = vmatprep.subr.bf16.mxu0 %v624_v0  ;;  %473 = vmatprep.subr.bf16.mxu1 %v624_v0 }
  0x26   :  { %p601_p13 = por %p600_p12, %p599_p11 }
  0x27   :  { %466 = vmatmul.mubr.msk.bf16.vlgmr.msra.gmra.mxu0 %vm79_vm1, %v55_v5 }
  0x28   :  { %490 = vmatpush3.bf16.msra.mxu0 %v538_v4  ;;  %505 = vmatprep.mubr.msk.bf16.mxu0 %vm625_vm0, %v624_v0  ;;  %p602_p0 = pnand %p601_p13, %p595_p10 }
  0x29   :  { %491 = vmatprep.subr.bf16.mxu0 %v624_v0  ;;  %474 = vmatpush3.bf16.msra.mxu1 %v540_v7 }
  0x2a   :  { %475 = vmatprep.subr.bf16.mxu1 %v624_v0 }
  0x2c   :  { %492 = vmatpush3.bf16.msra.mxu0 %v539_v6 }
  0x2d   :  { %493 = vmatprep.subr.bf16.mxu0 %v624_v0  ;;  %476 = vmatpush3.bf16.msra.mxu1 %v541_v8 }
  0x2e   :  { %477 = vmatprep.subr.bf16.mxu1 %v624_v0 }
  0x30   :  { %494 = vmatpush3.bf16.msra.mxu0 %v540_v7 }
  0x31   :  { %495 = vmatprep.subr.bf16.mxu0 %v624_v0  ;;  %478 = vmatpush3.bf16.msra.mxu1 %v542_v9 }
  0x32   :  { %479 = vmatprep.subr.bf16.mxu1 %v624_v0 }
  0x34   :  { %496 = vmatpush3.bf16.msra.mxu0 %v541_v8 }
  0x35   :  { %497 = vmatprep.subr.bf16.mxu0 %v624_v0  ;;  %480 = vmatpush3.bf16.msra.mxu1 %v543_v10 }
  0x36   :  { %481 = vmatprep.subr.bf16.mxu1 %v624_v0 }
  0x38   :  { %498 = vmatpush3.bf16.msra.mxu0 %v542_v9 }
  0x39   :  { %499 = vmatprep.subr.bf16.mxu0 %v624_v0  ;;  %482 = vmatpush3.bf16.msra.mxu1 %v544_v11 }
  0x3a   :  { %483 = vmatprep.subr.bf16.mxu1 %v624_v0 }
  0x3c   :  { %500 = vmatpush3.bf16.msra.mxu0 %v543_v10 }
  0x3d   :  { %501 = vmatprep.subr.bf16.mxu0 %v624_v0  ;;  %484 = vmatpush3.bf16.msra.mxu1 %v545_v12 }
  0x3e   :  { %509 = vmatprep.subr.bf16.mxu1 %v624_v0 }
  0x40   :  { %502 = vmatpush3.bf16.msra.mxu0 %v544_v11 }
  0x41   :  { %503 = vmatprep.subr.bf16.mxu0 %v624_v0 }
  0x44   :  { %504 = vmatpush3.bf16.msra.mxu0 %v545_v12 }
  0xe7   :  { %v117_v14 = vpop.f32.mrf.mxu0 }
  0xe8   :  { %v118_v15 = vadd.f32 %v409_v13, %v117_v14 }
  0xe9   :  { %v467_v16 = vpop.f32.mrf.mxu0 }
  0xea   :  { %v123_v17 = vmax.f32 %v118_v15, 0.0 }
  0xeb   :  { %v120_v18 = vpop.f32.mrf.mxu0 }
  0xec   :  { %v124_v19 = vpack.c.bf16 %v123_v17, %v123_v17 }
  0xed   :  { %v468_v20 = vpop.f32.mrf.mxu0 }
  0xee   :  { %486 = vmatmul.mubr.bf16.vlgmr.msra.gmra.mxu1 %v124_v19 }
  0xef   :  { %525 = vmatprep.mubr.msk.bf16.mxu1 %vm625_vm0, %v624_v0  ;;  %510 = vmatpush3.bf16.msra.mxu1 %v546_v21 }
  0xf0   :  { %511 = vmatprep.subr.bf16.mxu1 %v624_v0 }
  0xf3   :  { %512 = vmatpush3.bf16.msra.mxu1 %v547_v22 }
  0xf4   :  { %513 = vmatprep.subr.bf16.mxu1 %v624_v0 }
  0xf7   :  { %514 = vmatpush3.bf16.msra.mxu1 %v548_v23 }
  0xf8   :  { %515 = vmatprep.subr.bf16.mxu1 %v624_v0 }
  0xfb   :  { %516 = vmatpush3.bf16.msra.mxu1 %v549_v24 }
  0xfc   :  { %517 = vmatprep.subr.bf16.mxu1 %v624_v0 }
  0xff   :  { %518 = vmatpush3.bf16.msra.mxu1 %v550_v25 }
 0x100   :  { %519 = vmatprep.subr.bf16.mxu1 %v624_v0 }
 0x103   :  { %520 = vmatpush3.bf16.msra.mxu1 %v551_v26 }
 0x104   :  { %521 = vmatprep.subr.bf16.mxu1 %v624_v0 }
 0x107   :  { %522 = vmatpush3.bf16.msra.mxu1 %v552_v35 }
 0x108   :  { %523 = vmatprep.subr.bf16.mxu1 %v624_v0 }
 0x10b   :  { %524 = vmatpush3.bf16.msra.mxu1 %v553_v36 }
 0x1ae   :  { %v230_v28 = vpop.f32.mrf.mxu1 }
 0x1af   :  { %v231_v29 = vadd.f32 %v413_v27, %v230_v28 }
 0x1b0   :  { %v487_v30 = vpop.f32.mrf.mxu1 }
 0x1b1   :  { %v236_v31 = vmax.f32 %v231_v29, 0.0 }
 0x1b2   :  { %v233_v32 = vpop.f32.mrf.mxu1 }
 0x1b3   :  { %v237_v33 = vpack.c.bf16 %v236_v31, %v236_v31 }
 0x1b4   :  { %v488_v34 = vpop.f32.mrf.mxu1 }
 0x1b5   :  { %506 = vmatmul.mubr.bf16.vlgmr.msra.gmra.mxu0 %v237_v33 }
 0x275   :  { %v272_v37 = vpop.f32.mrf.mxu0 }
 0x276   :  { %v273_v38 = vadd.f32 %v413_v27, %v272_v37 }
 0x277   :  { %v507_v39 = vpop.f32.mrf.mxu0 }
 0x278   :  { %v278_v40 = vmax.f32 %v273_v38, 0.0 }
 0x279   :  { %v275_v41 = vpop.f32.mrf.mxu0 }
 0x27a   :  { %v279_v42 = vpack.c.bf16 %v278_v40, %v278_v40 }
 0x27b   :  { %v508_v43 = vpop.f32.mrf.mxu0 }
 0x27c   :  { %526 = vmatmul.mubr.bf16.vlgmr.msra.gmra.mxu1 %v279_v42 }
 0x33c   :  { %v385_v45 = vpop.f32.mrf.mxu1 }
 0x33d   :  { %v386_v46 = vadd.f32 %v422_v44, %v385_v45 }
 0x33e   :  { %v527_v47 = vpop.f32.mrf.mxu1 }
 0x33f   :  { %392 = vst.msk [vmem:[#allocation7] sm:$0xff] %vm391_vm2, %v386_v46 }
 0x340   :  { %v388_v48 = vpop.f32.mrf.mxu1 }
 0x341   :  { %605 = shalt.err (!%p602_p0)
}
 0x342   :  { %402 = dma.vmem_to_hbm [thread:$0]  %s400_s22, 128, %s774_s7, [#allocation4]   ;;  %v528_v49 = vpop.f32.mrf.mxu1 }
 0x343   :  { %618 = dma.done.wait [#allocation4], 128  }
 0x344   :  { %619 = vsyncadd [#allocation4], 4294967168 }
 0x345   :  { %406 = vsyncpa [#allocation3], 1 }
 0x346   :  { %407 = vsyncpa [#allocation6], 1 }
 0x347   :  { %408 = vsyncpa [#allocation4], 1 }

// kernel: tpu_custom_call.1
= control target key start
LH: loop header
LB: loop body
LE: loop exit
PB: predicated region body
PF: predicated region fallthrough
CT: control target
= control target key end

     0   :  { %12 = vsyncpa [#allocation3], 0  ;;  %s767_s0 = inlined_call_operand.vmem [shape: f32[8,32], index: 0, kind: input, shape index: {}]   ;;  %s768_s1 = inlined_call_operand.hbm [shape: bf16[32,128], index: 1, kind: input, shape index: {}]   ;;  %s769_s2 = inlined_call_operand.vmem [shape: f32[1,128], index: 2, kind: input, shape index: {}]   ;;  %s770_s3 = inlined_call_operand.vmem [shape: bf16[128,128], index: 3, kind: input, shape index: {}]   ;;  %s771_s4 = inlined_call_operand.hbm [shape: f32[1,128], index: 4, kind: input, shape index: {}]   ;;  %s772_s5 = inlined_call_operand.vmem [shape: bf16[128,8], index: 5, kind: input, shape index: {}]   ;;  %s773_s6 = inlined_call_operand.vmem [shape: f32[1,8], index: 6, kind: input, shape index: {}]   ;;  %s774_s7 = inlined_call_operand.hbm [shape: f32[8,8], index: 7, kind: output, shape index: {}]  }
   0x1   :  { %13 = vsyncpa [#allocation6], 0 }
   0x2   :  { %14 = vsyncpa [#allocation4], 0  ;;  %s620_s24 = smov [#allocation2]  }
   0x3   :  { %s22_s25 = sshll.u32 %s620_s24, 4  ;;  %s23_s25 = int_to_ptr.vmem [resolvable:$true] %s22_s25 }
   0x4   :  { %s562_s26 = scalar_lea.vmem %s23_s25, 256  ;;  %p567_p1 = scmp.lt.s32.totalorder %s23_s25, %s23_s25 }
   0x5   :  { %p563_p0 = scmp.ne.s32.totalorder %s23_s25, %s562_s26  ;;  %p568_p2 = scmp.lt.s32.totalorder %s562_s26, %s562_s26 }
   0x7   :  { %p569_p3 = por %p568_p2, %p567_p1 }
   0x9   :  { %p570_p4 = pnand %p569_p3, %p563_p0 }
   0xb   :  { %573 = shalt.err (!%p570_p4)
}
   0xc   :  { %s621_s27 = smov 64   ;;  %s622_s28 = smov 4  }
   0xd   :  { %28 = dma.hbm_to_vmem [thread:$0]  %s768_s1, 256, %s23_s25, [#allocation3], %s621_s27, %s621_s27, %s622_s28  }
   0xe   :  { %s623_s8 = smov [#allocation5]  }
   0xf   :  { %s39_s9 = sshll.u32 %s623_s8, 4  ;;  %s40_s9 = int_to_ptr.vmem [resolvable:$true] %s39_s9 }
  0x10   :  { %s582_s10 = scalar_lea.vmem %s40_s9, 16  ;;  %s586_s11 = scalar_lea.vmem %s40_s9, 32 }
  0x11   :  { %p583_p5 = scmp.ne.s32.totalorder %s40_s9, %s582_s10  ;;  %p587_p6 = scmp.lt.s32.totalorder %s40_s9, %s40_s9 }
  0x12   :  { %p588_p7 = scmp.lt.s32.totalorder %s586_s11, %s582_s10 }
  0x14   :  { %p589_p8 = por %p588_p7, %p587_p6 }
  0x16   :  { %p590_p9 = pnand %p589_p8, %p583_p5 }
  0x18   :  { %593 = shalt.err (!%p590_p9)
}
  0x19   :  { %42 = dma.hbm_to_vmem [thread:$0]  %s771_s4, 16, %s40_s9, [#allocation6]  }
  0x1a   :  { %614 = dma.done.wait [#allocation3], 256  }
  0x1b   :  { %615 = vsyncadd [#allocation3], 4294967040 }
  0x1c   :  { %616 = dma.done.wait [#allocation6], 16  }
  0x1d   :  { %617 = vsyncadd [#allocation6], 4294967280  ;;  %v624_v0 = vmov 0.0   ;;  %vm625_vm0 = vmmov 0   ;;  %v536_v1 = vld [vmem:[#allocation2 + $0x8] sm:$0xff]   ;;  %v537_v2 = vld [vmem:[#allocation2] sm:$0xff]  }
  0x1e   :  { %461 = vmatprep.subr.bf16.mxu0 %v624_v0  ;;  %465 = vmatprep.mubr.msk.bf16.mxu0 %vm625_vm0, %v624_v0  ;;  %v54_v3 = vld [vmem:[%s767_s0] sm:$0xff]  ;;  %v538_v4 = vld [vmem:[%s770_s3 + $0x38] sm:$0xff]   ;;  %v539_v6 = vld [vmem:[%s770_s3 + $0x30] sm:$0xff]   ;;  %vm79_vm1 = vcmask 261120   ;;  %s626_s21 = smov [#allocation7]   ;;  %vm391_vm2 = vcmask 64512  }
  0x1f   :  { %469 = vmatprep.subr.bf16.mxu1 %v624_v0  ;;  %485 = vmatprep.mubr.msk.bf16.mxu1 %vm625_vm0, %v624_v0  ;;  %v55_v5 = vpack.c.bf16 %v54_v3, %v54_v3  ;;  %v540_v7 = vld [vmem:[%s770_s3 + $0x28] sm:$0xff]   ;;  %v541_v8 = vld [vmem:[%s770_s3 + $0x20] sm:$0xff]   ;;  %v542_v9 = vld [vmem:[%s770_s3 + $0x18] sm:$0xff]   ;;  %s399_s22 = sshll.u32 %s626_s21, 4  ;;  %s400_s22 = int_to_ptr.vmem [resolvable:$true] %s399_s22 }
  0x20   :  { %462 = vmatpush3.bf16.msra.mxu0 %v536_v1  ;;  %470 = vmatpush3.bf16.msra.mxu1 %v538_v4  ;;  %v543_v10 = vld [vmem:[%s770_s3 + $0x10] sm:$0xff]   ;;  %v544_v11 = vld [vmem:[%s770_s3 + $0x8] sm:$0xff]   ;;  %v545_v12 = vld [vmem:[%s770_s3] sm:$0xff]   ;;  %p599_p11 = scmp.lt.s32.totalorder %s400_s22, %s400_s22 }
  0x21   :  { %463 = vmatprep.subr.bf16.mxu0 %v624_v0  ;;  %471 = vmatprep.subr.bf16.mxu1 %v624_v0  ;;  %v409_v13 = vld [vmem:[%s769_s2] ss:$0 sm:$0xff]  ;;  %v546_v21 = vld [vmem:[%s772_s5 + $0x38] sm:$0xff]   ;;  %v547_v22 = vld [vmem:[%s772_s5 + $0x30] sm:$0xff]  }
  0x22   :  { %v548_v23 = vld [vmem:[%s772_s5 + $0x28] sm:$0xff]   ;;  %v549_v24 = vld [vmem:[%s772_s5 + $0x20] sm:$0xff]   ;;  %v550_v25 = vld [vmem:[%s772_s5 + $0x18] sm:$0xff]  }
  0x23   :  { %v551_v26 = vld [vmem:[%s772_s5 + $0x10] sm:$0xff]   ;;  %v552_v35 = vld [vmem:[%s772_s5 + $0x8] sm:$0xff]   ;;  %v553_v36 = vld [vmem:[%s772_s5] sm:$0xff]   ;;  %s594_s5 = scalar_lea.vmem %s400_s22, 128 }
  0x24   :  { %464 = vmatpush3.bf16.msra.mxu0 %v537_v2  ;;  %472 = vmatpush3.bf16.msra.mxu1 %v539_v6  ;;  %v413_v27 = vld [vmem:[#allocation5] ss:$0 sm:$0xff]  ;;  %v422_v44 = vld [vmem:[%s773_s6] ss:$0 sm:$0xff]  ;;  %p595_p10 = scmp.ne.s32.totalorder %s400_s22, %s594_s5  ;;  %p600_p12 = scmp.lt.s32.totalorder %s594_s5, %s594_s5 }
  0x25   :  { %489 = vmatprep.subr.bf16.mxu0 %v624_v0  ;;  %473 = vmatprep.subr.bf16.mxu1 %v624_v0 }
  0x26   :  { %p601_p13 = por %p600_p12, %p599_p11 }
  0x27   :  { %466 = vmatmul.mubr.msk.bf16.vlgmr.msra.gmra.mxu0 %vm79_vm1, %v55_v5 }
  0x28   :  { %490 = vmatpush3.bf16.msra.mxu0 %v538_v4  ;;  %505 = vmatprep.mubr.msk.bf16.mxu0 %vm625_vm0, %v624_v0  ;;  %p602_p0 = pnand %p601_p13, %p595_p10 }
  0x29   :  { %491 = vmatprep.subr.bf16.mxu0 %v624_v0  ;;  %474 = vmatpush3.bf16.msra.mxu1 %v540_v7 }
  0x2a   :  { %475 = vmatprep.subr.bf16.mxu1 %v624_v0 }
  0x2c   :  { %492 = vmatpush3.bf16.msra.mxu0 %v539_v6 }
  0x2d   :  { %493 = vmatprep.subr.bf16.mxu0 %v624_v0  ;;  %476 = vmatpush3.bf16.msra.mxu1 %v541_v8 }
  0x2e   :  { %477 = vmatprep.subr.bf16.mxu1 %v624_v0 }
  0x30   :  { %494 = vmatpush3.bf16.msra.mxu0 %v540_v7 }
  0x31   :  { %495 = vmatprep.subr.bf16.mxu0 %v624_v0  ;;  %478 = vmatpush3.bf16.msra.mxu1 %v542_v9 }
  0x32   :  { %479 = vmatprep.subr.bf16.mxu1 %v624_v0 }
  0x34   :  { %496 = vmatpush3.bf16.msra.mxu0 %v541_v8 }
  0x35   :  { %497 = vmatprep.subr.bf16.mxu0 %v624_v0  ;;  %480 = vmatpush3.bf16.msra.mxu1 %v543_v10 }
  0x36   :  { %481 = vmatprep.subr.bf16.mxu1 %v624_v0 }
  0x38   :  { %498 = vmatpush3.bf16.msra.mxu0 %v542_v9 }
  0x39   :  { %499 = vmatprep.subr.bf16.mxu0 %v624_v0  ;;  %482 = vmatpush3.bf16.msra.mxu1 %v544_v11 }
  0x3a   :  { %483 = vmatprep.subr.bf16.mxu1 %v624_v0 }
  0x3c   :  { %500 = vmatpush3.bf16.msra.mxu0 %v543_v10 }
  0x3d   :  { %501 = vmatprep.subr.bf16.mxu0 %v624_v0  ;;  %484 = vmatpush3.bf16.msra.mxu1 %v545_v12 }
  0x3e   :  { %509 = vmatprep.subr.bf16.mxu1 %v624_v0 }
  0x40   :  { %502 = vmatpush3.bf16.msra.mxu0 %v544_v11 }
  0x41   :  { %503 = vmatprep.subr.bf16.mxu0 %v624_v0 }
  0x44   :  { %504 = vmatpush3.bf16.msra.mxu0 %v545_v12 }
  0xe7   :  { %v117_v14 = vpop.f32.mrf.mxu0 }
  0xe8   :  { %v118_v15 = vadd.f32 %v409_v13, %v117_v14 }
  0xe9   :  { %v467_v16 = vpop.f32.mrf.mxu0 }
  0xea   :  { %v123_v17 = vmax.f32 %v118_v15, 0.0 }
  0xeb   :  { %v120_v18 = vpop.f32.mrf.mxu0 }
  0xec   :  { %v124_v19 = vpack.c.bf16 %v123_v17, %v123_v17 }
  0xed   :  { %v468_v20 = vpop.f32.mrf.mxu0 }
  0xee   :  { %486 = vmatmul.mubr.bf16.vlgmr.msra.gmra.mxu1 %v124_v19 }
  0xef   :  { %525 = vmatprep.mubr.msk.bf16.mxu1 %vm625_vm0, %v624_v0  ;;  %510 = vmatpush3.bf16.msra.mxu1 %v546_v21 }
  0xf0   :  { %511 = vmatprep.subr.bf16.mxu1 %v624_v0 }
  0xf3   :  { %512 = vmatpush3.bf16.msra.mxu1 %v547_v22 }
  0xf4   :  { %513 = vmatprep.subr.bf16.mxu1 %v624_v0 }
  0xf7   :  { %514 = vmatpush3.bf16.msra.mxu1 %v548_v23 }
  0xf8   :  { %515 = vmatprep.subr.bf16.mxu1 %v624_v0 }
  0xfb   :  { %516 = vmatpush3.bf16.msra.mxu1 %v549_v24 }
  0xfc   :  { %517 = vmatprep.subr.bf16.mxu1 %v624_v0 }
  0xff   :  { %518 = vmatpush3.bf16.msra.mxu1 %v550_v25 }
 0x100   :  { %519 = vmatprep.subr.bf16.mxu1 %v624_v0 }
 0x103   :  { %520 = vmatpush3.bf16.msra.mxu1 %v551_v26 }
 0x104   :  { %521 = vmatprep.subr.bf16.mxu1 %v624_v0 }
 0x107   :  { %522 = vmatpush3.bf16.msra.mxu1 %v552_v35 }
 0x108   :  { %523 = vmatprep.subr.bf16.mxu1 %v624_v0 }
 0x10b   :  { %524 = vmatpush3.bf16.msra.mxu1 %v553_v36 }
 0x1ae   :  { %v230_v28 = vpop.f32.mrf.mxu1 }
 0x1af   :  { %v231_v29 = vadd.f32 %v413_v27, %v230_v28 }
 0x1b0   :  { %v487_v30 = vpop.f32.mrf.mxu1 }
 0x1b1   :  { %v236_v31 = vmax.f32 %v231_v29, 0.0 }
 0x1b2   :  { %v233_v32 = vpop.f32.mrf.mxu1 }
 0x1b3   :  { %v237_v33 = vpack.c.bf16 %v236_v31, %v236_v31 }
 0x1b4   :  { %v488_v34 = vpop.f32.mrf.mxu1 }
 0x1b5   :  { %506 = vmatmul.mubr.bf16.vlgmr.msra.gmra.mxu0 %v237_v33 }
 0x275   :  { %v272_v37 = vpop.f32.mrf.mxu0 }
 0x276   :  { %v273_v38 = vadd.f32 %v413_v27, %v272_v37 }
 0x277   :  { %v507_v39 = vpop.f32.mrf.mxu0 }
 0x278   :  { %v278_v40 = vmax.f32 %v273_v38, 0.0 }
 0x279   :  { %v275_v41 = vpop.f32.mrf.mxu0 }
 0x27a   :  { %v279_v42 = vpack.c.bf16 %v278_v40, %v278_v40 }
 0x27b   :  { %v508_v43 = vpop.f32.mrf.mxu0 }
 0x27c   :  { %526 = vmatmul.mubr.bf16.vlgmr.msra.gmra.mxu1 %v279_v42 }
 0x33c   :  { %v385_v45 = vpop.f32.mrf.mxu1 }
 0x33d   :  { %v386_v46 = vadd.f32 %v422_v44, %v385_v45 }
 0x33e   :  { %v527_v47 = vpop.f32.mrf.mxu1 }
 0x33f   :  { %392 = vst.msk [vmem:[#allocation7] sm:$0xff] %vm391_vm2, %v386_v46 }
 0x340   :  { %v388_v48 = vpop.f32.mrf.mxu1 }
 0x341   :  { %605 = shalt.err (!%p602_p0)
}
 0x342   :  { %402 = dma.vmem_to_hbm [thread:$0]  %s400_s22, 128, %s774_s7, [#allocation4]   ;;  %v528_v49 = vpop.f32.mrf.mxu1 }
 0x343   :  { %618 = dma.done.wait [#allocation4], 128  }
 0x344   :  { %619 = vsyncadd [#allocation4], 4294967168 }
 0x345   :  { %406 = vsyncpa [#allocation3], 1 }
 0x346   :  { %407 = vsyncpa [#allocation6], 1 }
 0x347   :  { %408 = vsyncpa [#allocation4], 1 }

</bundles_post_ra>
